<compile_context>
chip_gen: v6e
topology: v6e:2x2x1
jax: 0.10.0
libtpu: 0.0.40
codegen_flags: <defaults>
</compile_context>

<pallas_src>
import functools

import jax
import jax.numpy as jnp
from jax.experimental import pallas as pl
from jax.experimental.pallas import tpu as pltpu


_MiB = 1024 * 1024

# Dispatch on x *bytes*: below this, a fused XLA dot (which can fuse with x's
# producer and avoid an HBM round trip) beats a standalone pallas_call.
_PALLAS_MIN_X_BYTES = 16 * _MiB

_VMEM_HEADROOM_BYTES = 2 * _MiB


def _round_up(x, m):
    return ((x + m - 1) // m) * m


@functools.lru_cache(maxsize=1)
def _vmem_limit_bytes():
    """Generation-aware scoped-VMEM limit.

    v5e / v6e: 128 MiB physical  -> 64 MiB scoped limit (default is 16/32 MiB).
    v7x:        64 MiB per TC    -> 48 MiB (leave headroom; a tile sized for
                                    128 MiB chips would OOM here).
    """
    cap = 64 * _MiB  # conservative default = v7x per-TC physical
    try:
        cap = int(pltpu.get_tpu_info().vmem_capacity_bytes)
    except Exception:
        pass
    if cap >= 100 * _MiB:
        return 64 * _MiB
    return 48 * _MiB


def _pick_batch_tile(B, H, C, x_itemsize, out_itemsize):
    """Largest batch tile whose VMEM working set fits the generation's budget.

    Budget model (padded to the (8,128) VMEM tiling):
      x tile, out tile: double-buffered by the pipeline.
      W, b:             single copy (pl.Buffered(1), constant index map).
    Returns 0 if even an 8-row tile does not fit (caller falls back to XLA).
    """
    limit = _vmem_limit_bytes()
    h_pad = _round_up(H, 128)
    c_pad = _round_up(C, 128)
    w_bytes = _round_up(H, 8) * c_pad * 4          # f32 weight, one copy
    b_bytes = 8 * c_pad * 4                        # f32 bias, one copy
    per_row = 2 * (h_pad * x_itemsize + c_pad * out_itemsize)

    avail = limit - w_bytes - b_bytes - _VMEM_HEADROOM_BYTES
    if avail <= 0:
        return 0

    tb = min(avail // per_row, B)
    if tb >= B:
        if B > 512:
            # Megacore (v7x): never a single-block grid for moderate B — split
            # into >=2 balanced tiles so the "parallel" axis spans both TCs
            # (they share HBM; using both is required to saturate it).
            return min(_round_up(pl.cdiv(B, 2), 128), B)
        return B  # single block; block_shape == full dims is always legal
    if tb < 8:
        return 0
    # Partial-B tiles must be sublane-aligned; prefer 128-row multiples.
    if tb >= 128:
        return (tb // 128) * 128
    return (tb // 8) * 8


def _linear_kernel(x_ref, w_ref, b_ref, o_ref):
    x = x_ref[...]
    w = w_ref[...]
    if w.dtype != x.dtype:
        # bf16 activations: feed bf16 x bf16 to the MXU, accumulate in f32.
        w = w.astype(x.dtype)
    acc = jnp.dot(x, w, preferred_element_type=jnp.float32)
    o_ref[...] = (acc + b_ref[...].astype(jnp.float32)).astype(o_ref.dtype)


@functools.partial(jax.jit, static_argnames=("batch_tile",))
def classification_head_fc(x, w, b, *, batch_tile=None):
    """logits_f32 = x @ w + b via a batch-tiled, pipelined Pallas kernel."""
    B, H = x.shape
    H2, C = w.shape
    assert H == H2 and b.shape == (1, C)

    if batch_tile is not None:
        tb = int(min(batch_tile, B))
        assert tb == B or tb % 8 == 0, "batch_tile must be a multiple of 8"
    else:
        tb = _pick_batch_tile(B, H, C, x.dtype.itemsize, 4)

    if tb <= 0:
        # A single-row tile for this H doesn't fit the VMEM budget.
        # TODO(synk): add a K-tiled (grid=(B_tiles, K_tiles)) accumulator path
        # for H large enough that a (8, H) slab exceeds VMEM.
        return jnp.dot(x, w, preferred_element_type=jnp.float32) + b.astype(
            jnp.float32)

    grid = (pl.cdiv(B, tb),)

    cost = pl.CostEstimate(
        flops=2 * B * H * C,
        transcendentals=0,
        bytes_accessed=(B * H * x.dtype.itemsize
                        + H * C * w.dtype.itemsize
                        + C * b.dtype.itemsize
                        + B * C * 4),
    )

    return pl.pallas_call(
        _linear_kernel,
        out_shape=jax.ShapeDtypeStruct((B, C), jnp.float32),
        grid_spec=pltpu.PrefetchScalarGridSpec(
            num_scalar_prefetch=0,
            grid=grid,
            in_specs=[
                # x: streamed batch tiles (double-buffered by the pipeline).
                # The last tile may be partial (B % tb != 0); rows are
                # independent so the OOB-padded rows are simply never written.
                pl.BlockSpec((tb, H), lambda i: (i, 0)),
                # W, b: constant index map + single buffer -> resident in VMEM.
                pl.BlockSpec((H, C), lambda i: (0, 0),
                             pipeline_mode=pl.Buffered(1)),
                pl.BlockSpec((1, C), lambda i: (0, 0),
                             pipeline_mode=pl.Buffered(1)),
            ],
            out_specs=pl.BlockSpec((tb, C), lambda i: (i, 0)),
        ),
        compiler_params=pltpu.CompilerParams(
            # Independent batch tiles -> megacore-shardable (both TCs share
            # HBM; splitting the grid lets the kernel use both).
            dimension_semantics=("parallel",),
            vmem_limit_bytes=_vmem_limit_bytes(),
        ),
        cost_estimate=cost,
    )(x, w, b)


class ClassificationHead:
    """JAX/Pallas port of the PyTorch ClassificationHead."""

    def __init__(self, hid_dim, n_classes, key, compute_dtype=None):
        out_dim = 1 if n_classes == 2 else n_classes
        self.binary = (n_classes == 2)
        # Optional bf16 activation path (halves the dominant HBM x traffic;
        # accumulation stays f32). Default None keeps PyTorch-f32 numerics.
        self.compute_dtype = compute_dtype
        kw, kb = jax.random.split(key)
        # Deterministic init mirroring nn.Linear's U(-1/sqrt(fan_in), +).
        bound = 1.0 / jnp.sqrt(jnp.float32(hid_dim))
        # Stored already transposed: (hid_dim, out_dim).
        self.w = jax.random.uniform(
            kw, (hid_dim, out_dim), jnp.float32, -bound, bound)
        self.b = jax.random.uniform(
            kb, (1, out_dim), jnp.float32, -bound, bound)

    def __call__(self, x):
        if self.compute_dtype is not None:
            x = x.astype(self.compute_dtype)
        x_bytes = x.shape[0] * x.shape[1] * x.dtype.itemsize
        if x_bytes < _PALLAS_MIN_X_BYTES:
            # Small x: let XLA fuse the matmul + bias with x's producer.
            y = jnp.dot(x, self.w, preferred_element_type=jnp.float32) + self.b
        else:
            y = classification_head_fc(x, self.w, self.b)
        return (y, self.binary)


if __name__ == "__main__":
    key = jax.random.PRNGKey(0)
    k_x, k_head_multi, k_head_bin, k_xl = jax.random.split(key, 4)

    batch, hid_dim = 8, 32
    x = jax.random.normal(k_x, (batch, hid_dim), jnp.float32)

    # Multi-class case (n_classes != 2): small x -> fused XLA path.
    n_classes = 5
    head = ClassificationHead(hid_dim, n_classes, k_head_multi)
    logits, binary = head(x)
    logits = jax.block_until_ready(logits)
    assert logits.shape == (batch, n_classes)
    assert binary is False
    assert jnp.allclose(logits, x @ head.w + head.b, atol=1e-5, rtol=1e-5)

    # Binary case (n_classes == 2): fc maps hid_dim -> 1.
    head_bin = ClassificationHead(hid_dim, 2, k_head_bin)
    logits_bin, binary_bin = head_bin(x)
    logits_bin = jax.block_until_ready(logits_bin)
    assert logits_bin.shape == (batch, 1)
    assert binary_bin is True
    assert jnp.allclose(logits_bin, x @ head_bin.w + head_bin.b,
                        atol=1e-5, rtol=1e-5)

    # Exercise the Pallas kernel directly.
    # (a) single-block path (block shapes == full array dims).
    y_small = classification_head_fc(x, head.w, head.b)
    y_small = jax.block_until_ready(y_small)
    assert y_small.dtype == jnp.float32
    assert jnp.allclose(y_small, x @ head.w + head.b, atol=1e-5, rtol=1e-5)

    # (b) tiled / pipelined path with a PARTIAL last tile (272 = 2*128 + 16):
    #     x streamed in (128, H) blocks, W & b resident (Buffered(1)).
    B2, H2 = 272, 128
    x_big = jax.random.normal(k_xl, (B2, H2), jnp.float32)
    head_big = ClassificationHead(H2, n_classes, k_head_multi)
    y_big = classification_head_fc(x_big, head_big.w, head_big.b,
                                   batch_tile=128)
    y_big = jax.block_until_ready(y_big)
    ref_big = x_big @ head_big.w + head_big.b
    assert y_big.shape == (B2, n_classes)
    assert jnp.allclose(y_big, ref_big, atol=1e-4, rtol=1e-4)

    # (c) bf16 activation path: bf16 x, f32 W/b (cast in-kernel), f32 logits.
    x_bf16 = x_big.astype(jnp.bfloat16)
    y_bf16 = classification_head_fc(x_bf16, head_big.w, head_big.b,
                                    batch_tile=128)
    y_bf16 = jax.block_until_ready(y_bf16)
    ref_bf16 = x_bf16.astype(jnp.float32) @ head_big.w + head_big.b
    assert y_bf16.dtype == jnp.float32
    assert jnp.allclose(y_bf16, ref_bf16, atol=3e-2, rtol=3e-2)

    print("KERNEL_OK")
</pallas_src>

<mosaic_0001>
module attributes {stable_mosaic.version = 11 : i64} {
  func.func @_linear_kernel(%arg0: i32, %arg1: memref<8x32xf32, #tpu.memory_space<vmem>>, %arg2: memref<32x5xf32, #tpu.memory_space<vmem>>, %arg3: memref<1x5xf32, #tpu.memory_space<vmem>>, %arg4: memref<8x5xf32, #tpu.memory_space<vmem>>) attributes {dimension_semantics = [#tpu.dimension_semantics<parallel>], iteration_bounds = array<i64: 1>, scalar_prefetch = 0 : i64, scratch_operands = 0 : i64, tpu.core_type = #tpu.core_type<tc>, window_params = [{transform_indices = @transform_0, window_bounds = array<i64: 8, 32>}, {pipeline_mode = #tpu.pipeline_mode<synchronous>, transform_indices = @transform_1, window_bounds = array<i64: 32, 5>}, {pipeline_mode = #tpu.pipeline_mode<synchronous>, transform_indices = @transform_2, window_bounds = array<i64: 1, 5>}, {transform_indices = @transform_3, window_bounds = array<i64: 8, 5>}]} {
    %c0 = arith.constant 0 : index
    %c0_0 = arith.constant 0 : index
    %0 = vector.load %arg1[%c0, %c0_0] : memref<8x32xf32, #tpu.memory_space<vmem>>, vector<8x32xf32>
    %c0_1 = arith.constant 0 : index
    %c0_2 = arith.constant 0 : index
    %1 = vector.load %arg2[%c0_1, %c0_2] : memref<32x5xf32, #tpu.memory_space<vmem>>, vector<32x5xf32>
    %cst = arith.constant dense<0.000000e+00> : vector<8x5xf32>
    %2 = tpu.matmul %0, %1, %cst {dimension_numbers = #tpu.dot_dimension_numbers<[1], [0], [0], [1], [0, 0, 1, 1], [], []>} : vector<8x32xf32>, vector<32x5xf32>, vector<8x5xf32> -> vector<8x5xf32>
    %c0_3 = arith.constant 0 : index
    %c0_4 = arith.constant 0 : index
    %3 = vector.load %arg3[%c0_3, %c0_4] : memref<1x5xf32, #tpu.memory_space<vmem>>, vector<1x5xf32>
    %4 = vector.broadcast %3 : vector<1x5xf32> to vector<8x5xf32>
    %5 = arith.addf %2, %4 : vector<8x5xf32>
    %c0_5 = arith.constant 0 : index
    %c0_6 = arith.constant 0 : index
    %6 = vector.load %arg4[%c0_5, %c0_6] : memref<8x5xf32, #tpu.memory_space<vmem>>, vector<8x5xf32>
    tpu.vector_store %arg4[%c0_5, %c0_6], %5 {strides = array<i32>} : memref<8x5xf32, #tpu.memory_space<vmem>>, vector<8x5xf32>,
    return
  }
  func.func @transform_0(%arg0: i32) -> (i32, i32) {
    %c0_i32 = arith.constant 0 : i32
    %c0_i32_0 = arith.constant 0 : i32
    return %arg0, %c0_i32 : i32, i32
  }
  func.func @transform_1(%arg0: i32) -> (i32, i32) {
    %c0_i32 = arith.constant 0 : i32
    %c0_i32_0 = arith.constant 0 : i32
    %c0_i32_1 = arith.constant 0 : i32
    return %c0_i32, %c0_i32_0 : i32, i32
  }
  func.func @transform_2(%arg0: i32) -> (i32, i32) {
    %c0_i32 = arith.constant 0 : i32
    %c0_i32_0 = arith.constant 0 : i32
    %c0_i32_1 = arith.constant 0 : i32
    return %c0_i32, %c0_i32_0 : i32, i32
  }
  func.func @transform_3(%arg0: i32) -> (i32, i32) {
    %c0_i32 = arith.constant 0 : i32
    %c0_i32_0 = arith.constant 0 : i32
    return %arg0, %c0_i32 : i32, i32
  }
}

</mosaic_0001>

<bundles_post_ra>
// kernel: classification_head_fc.1
= control target key start
LH: loop header
LB: loop body
LE: loop exit
PB: predicated region body
PF: predicated region fallthrough
CT: control target
= control target key end

     0   :  { %v160_v1 = vmov 0.0   ;;  %vm161_vm0 = vmmov 0   ;;  %s204_s0 = inlined_call_operand.vmem [shape: f32[8,32], index: 0, kind: input, shape index: {}]   ;;  %s205_s1 = inlined_call_operand.vmem [shape: f32[32,5], index: 1, kind: input, shape index: {}]   ;;  %s206_s2 = inlined_call_operand.vmem [shape: f32[1,5], index: 2, kind: input, shape index: {}]   ;;  %s207_s3 = inlined_call_operand.hbm [shape: f32[8,5], index: 3, kind: output, shape index: {}]  }
   0x1   :  { %v19_v0 = vld [vmem:[%s205_s1 + $0x18] sm:$0xff]  ;;  %124 = vmatprep.subr.mxu0 %v160_v1  ;;  %v18_v2 = vld [vmem:[%s205_s1 + $0x10] sm:$0xff]  ;;  %132 = vmatprep.mubr.msk.f32.mxu0 %vm161_vm0, %v160_v1 }
   0x2   :  { %125 = vmatpush3.msra.mxu0 %v19_v0 }
   0x3   :  { %8 = vsyncpa [#allocation3], 0  ;;  %126 = vmatprep.subr.mxu0 %v160_v1  ;;  %v17_v3 = vld [vmem:[%s205_s1 + $0x8] sm:$0xff]  ;;  %v16_v4 = vld [vmem:[%s205_s1] sm:$0xff]  ;;  %vm27_vm1 = vcmask 261120   ;;  %s162_s24 = smov [#allocation2]  }
   0x4   :  { %127 = vmatpush3.msra.mxu0 %v18_v2  ;;  %v15_v5 = vld [vmem:[%s204_s0] sm:$0xff]  ;;  %s109_s25 = sshll.u32 %s162_s24, 4  ;;  %vm101_vm2 = vcmask 39936   ;;  %s110_s25 = int_to_ptr.vmem [resolvable:$true] %s109_s25 }
   0x5   :  { %128 = vmatprep.subr.mxu0 %v160_v1  ;;  %v117_v6 = vld [vmem:[%s206_s2] ss:$0 sm:$0xff]  ;;  %s138_s1 = scalar_lea.vmem %s110_s25, 128  ;;  %p143_p1 = scmp.lt.s32.totalorder %s110_s25, %s110_s25 }
   0x6   :  { %129 = vmatpush3.msra.mxu0 %v17_v3  ;;  %p139_p0 = scmp.ne.s32.totalorder %s110_s25, %s138_s1  ;;  %p144_p2 = scmp.lt.s32.totalorder %s138_s1, %s138_s1 }
   0x7   :  { %130 = vmatprep.subr.mxu0 %v160_v1 }
   0x8   :  { %131 = vmatpush3.msra.mxu0 %v16_v4  ;;  %p145_p3 = por %p144_p2, %p143_p1 }
   0x9   :  { %133 = vmatmul.mubr.msk.f32.vlgmr.msra.gmra.mxu0 %vm27_vm1, %v15_v5 }
   0xa   :  { %p146_p4 = pnand %p145_p3, %p139_p0 }
  0xc9   :  { %v97_v7 = vpop.f32.mrf.mxu0 }
  0xca   :  { %v98_v8 = vadd.f32 %v117_v6, %v97_v7 }
  0xcb   :  { %v134_v9 = vpop.f32.mrf.mxu0 }
  0xcc   :  { %102 = vst.msk [vmem:[#allocation2] sm:$0xff] %vm101_vm2, %v98_v8 }
  0xcd   :  { %149 = shalt.err (!%p146_p4)
}
  0xce   :  { %112 = dma.vmem_to_hbm [thread:$0]  %s110_s25, 128, %s207_s3, [#allocation3]  }
  0xcf   :  { %158 = dma.done.wait [#allocation3], 128  }
  0xd0   :  { %159 = vsyncadd [#allocation3], 4294967168 }
  0xd1   :  { %116 = vsyncpa [#allocation3], 1 }

</bundles_post_ra>
